<compile_context>
chip_gen: v6e
topology: v6e:2x2x1
jax: 0.10.0
libtpu: 0.0.40
codegen_flags: <defaults>
</compile_context>

<pallas_src>
import functools
import math

import jax
import jax.numpy as jnp
from jax.experimental import pallas as pl
from jax.experimental.pallas import tpu as pltpu


def _round_up(v, m):
    return (v + m - 1) // m * m


def _sublane_gran(dtype):
    # Native sublane tiling: f32 -> 8, bf16/f16 -> 16, int8/fp8 -> 32.
    return 8 * max(1, 4 // jnp.dtype(dtype).itemsize)


def _vmem_cap_bytes():
    """Per-generation usable VMEM budget (leaves headroom for compiler scratch)."""
    try:
        phys = int(pltpu.get_tpu_info().vmem_capacity_bytes)
    except Exception:
        phys = 64 << 20  # conservative (v7x-sized) fallback
    # ~75% of physical, hard-capped well below v5e/v6e's 128 MiB.
    return int(min(phys * 3 // 4, 100 << 20))


def _pick_tile(dim, target, gran):
    """Largest tile <= target (multiple of gran) with near-minimal padding waste."""
    dim = _round_up(dim, gran)
    target = max(gran, _round_up(target, gran))
    if dim <= target:
        return dim
    cands = range(gran, target + 1, gran)
    min_waste = min(_round_up(dim, t) - dim for t in cands)
    thresh = max(min_waste, max(gran, dim // 16))
    return max(t for t in cands if _round_up(dim, t) - dim <= thresh)


def _halve(v, gran):
    return max(gran, _round_up(v // 2, gran))


def _linear_mul_kernel(*refs, has_bias, use_scratch_acc, mxu_dtype):
    """out = (x @ W + b) * y over one (tm, tn) output block.

    Grid = (M//tm, N//tn, K//tk); K is the innermost sequential reduction.
    W arrives pre-transposed as [K, N] so the contraction is a plain MXU
    matmul.  Bias is folded into the k==0 accumulator init; the elementwise
    multiply with y happens on the final K step.  If the output dtype is f32
    the accumulation happens directly in o_ref (no scratch).
    """
    if has_bias:
        x_ref, w_ref, b_ref, y_ref, o_ref = refs[:5]
        rest = refs[5:]
    else:
        x_ref, w_ref, y_ref, o_ref = refs[:4]
        b_ref = None
        rest = refs[4:]
    acc_ref = rest[0] if use_scratch_acc else o_ref

    k = pl.program_id(2)

    @pl.when(k == 0)
    def _():
        if has_bias:
            acc_ref[...] = jnp.broadcast_to(
                b_ref[...].astype(jnp.float32), acc_ref.shape)
        else:
            acc_ref[...] = jnp.zeros_like(acc_ref)

    x_tile = x_ref[...]
    w_tile = w_ref[...]
    if mxu_dtype is not None:
        # No-op if the wrapper already cast the operands.
        x_tile = x_tile.astype(mxu_dtype)
        w_tile = w_tile.astype(mxu_dtype)

    # x: (tm, tk) @ w: (tk, tn) -> (tm, tn), f32 accumulation on the MXU.
    acc_ref[...] += jnp.dot(x_tile, w_tile, preferred_element_type=jnp.float32)

    @pl.when(k == pl.num_programs(2) - 1)
    def _():
        o_ref[...] = (acc_ref[...] * y_ref[...].astype(jnp.float32)).astype(
            o_ref.dtype)


@functools.partial(jax.jit,
                   static_argnames=("tm", "tn", "tk", "mxu_dtype", "w_buffers"))
def linear_mul(x, y, weight, bias=None, *, tm=None, tn=None, tk=None,
               mxu_dtype=None, w_buffers=2):
    """Computes (x @ weight.T + bias) * y with a fused Pallas TPU kernel.

    x:      [..., K]   (K = in_features)
    y:      broadcastable against the linear output [..., N]
    weight: [N, K]     (PyTorch nn.Linear layout)
    bias:   [N] or None
    mxu_dtype: optional MXU operand dtype (e.g. jnp.bfloat16) — recommended
               fast mode on v6e/v7x; accumulation stays float32.
    w_buffers: pipeline depth for the weight stream (sweep 2 vs 3).
    """
    y = jnp.asarray(y)
    *lead, K = x.shape
    N, Kw = weight.shape
    assert Kw == K, "weight in_features must match x feature dim"

    out_dtype = jnp.result_type(x.dtype, weight.dtype, y.dtype)
    out_shape_full = tuple(lead) + (N,)
    M = int(math.prod(lead)) if lead else 1
    x2 = x.reshape(M, K)

    # --- weight: pre-transpose to [K, N] once in the wrapper (amortized over
    #     the M/tm in-kernel revisits; avoids per-k XLU transposes of W). -----
    w2 = weight.T
    if mxu_dtype is not None:
        w2 = w2.astype(mxu_dtype)   # halves the W HBM stream for bf16
        x2 = x2.astype(mxu_dtype)

    # --- y: avoid materializing broadcasts where possible ---------------------
    y_shape = (1,) * (len(out_shape_full) - y.ndim) + tuple(y.shape)
    y_r = y.reshape(y_shape)
    if y_shape[-1] == 1:
        # per-row (or scalar) multiplier -> (M, 1) column, broadcast in-kernel
        y2 = jnp.broadcast_to(y_r, tuple(lead) + (1,)).reshape(M, 1)
        y_mode = "col"
    elif all(d == 1 for d in y_shape[:-1]):
        # per-feature row, broadcast in-kernel
        y2 = y_r.reshape(1, N)
        y_mode = "row"
    else:
        y2 = jnp.broadcast_to(y_r, out_shape_full).reshape(M, N)
        y_mode = "full"

    has_bias = bias is not None
    b2 = bias.reshape(1, N) if has_bias else None
    use_scratch_acc = jnp.dtype(out_dtype) != jnp.dtype(jnp.float32)

    # --- hardware-granularity alignment (minimal padding) ---------------------
    sub_gran = max(_sublane_gran(x2.dtype), _sublane_gran(out_dtype))
    if y_mode != "row":
        sub_gran = max(sub_gran, _sublane_gran(y2.dtype))
    M_al = _round_up(M, sub_gran)
    N_al = _round_up(N, 128)
    K_al = _round_up(K, 128)

    # --- tile selection against a per-generation VMEM budget ------------------
    cap = _vmem_cap_bytes()
    tm = tm or _pick_tile(M_al, 512, sub_gran)
    tn = tn or _pick_tile(N_al, 1024, 128)
    tk = tk or _pick_tile(K_al, 512, 128)

    x_isz = jnp.dtype(x2.dtype).itemsize
    w_isz = jnp.dtype(w2.dtype).itemsize
    y_isz = jnp.dtype(y2.dtype).itemsize
    b_isz = jnp.dtype(b2.dtype).itemsize if has_bias else 0
    o_isz = jnp.dtype(out_dtype).itemsize

    def _usage(tm_, tn_, tk_):
        u = 2 * tm_ * tk_ * x_isz                    # x (double buffered)
        u += max(2, w_buffers) * tk_ * tn_ * w_isz   # W stream
        u += 2 * tm_ * tn_ * o_isz                   # output
        if has_bias:
            u += 2 * tn_ * b_isz
        u += 2 * (tn_ * y_isz if y_mode == "row"
                  else tm_ * y_isz if y_mode == "col"
                  else tm_ * tn_ * y_isz)
        if use_scratch_acc:
            u += tm_ * tn_ * 4
        return u

    # Shrink until the working set (plus margin) fits the per-gen VMEM budget.
    while _usage(tm, tn, tk) + (4 << 20) > cap:
        if tk > 128:
            tk = _halve(tk, 128)
        elif tn > 128:
            tn = _halve(tn, 128)
        elif tm > sub_gran:
            tm = _halve(tm, sub_gran)
        else:
            break

    # Keep >= 2 parallel output blocks so both v7x TensorCores get work.
    if (_round_up(M_al, tm) // tm) * (_round_up(N_al, tn) // tn) == 1:
        if tm % (2 * sub_gran) == 0:
            tm //= 2
        elif tn % 256 == 0:
            tn //= 2

    # --- pad to tile multiples (lane-dense stores, exact grid) ----------------
    M_pad = _round_up(M_al, tm)
    N_pad = _round_up(N_al, tn)
    K_pad = _round_up(K_al, tk)

    if (M_pad, K_pad) != (M, K):
        x2 = jnp.pad(x2, ((0, M_pad - M), (0, K_pad - K)))
    if (K_pad, N_pad) != (K, N):
        w2 = jnp.pad(w2, ((0, K_pad - K), (0, N_pad - N)))
    if has_bias and N_pad != N:
        b2 = jnp.pad(b2, ((0, 0), (0, N_pad - N)))
    if y_mode == "row":
        if N_pad != N:
            y2 = jnp.pad(y2, ((0, 0), (0, N_pad - N)))
        y_spec = pl.BlockSpec((1, tn), lambda i, j, k: (0, j))
    elif y_mode == "col":
        if M_pad != M:
            y2 = jnp.pad(y2, ((0, M_pad - M), (0, 0)))
        y_spec = pl.BlockSpec((tm, 1), lambda i, j, k: (i, 0))
    else:
        if (M_pad, N_pad) != (M, N):
            y2 = jnp.pad(y2, ((0, M_pad - M), (0, N_pad - N)))
        y_spec = pl.BlockSpec((tm, tn), lambda i, j, k: (i, j))

    grid = (M_pad // tm, N_pad // tn, K_pad // tk)
    grid_m, grid_n, grid_k = grid

    if w_buffers != 2:
        w_spec = pl.BlockSpec((tk, tn), lambda i, j, k: (k, j),
                              pipeline_mode=pl.Buffered(w_buffers))
    else:
        w_spec = pl.BlockSpec((tk, tn), lambda i, j, k: (k, j))

    in_specs = [pl.BlockSpec((tm, tk), lambda i, j, k: (i, k)), w_spec]
    inputs = [x2, w2]
    if has_bias:
        in_specs.append(pl.BlockSpec((1, tn), lambda i, j, k: (0, j)))
        inputs.append(b2)
    in_specs.append(y_spec)
    inputs.append(y2)

    scratch_shapes = ([pltpu.VMEM((tm, tn), jnp.float32)]
                      if use_scratch_acc else [])

    vmem_bytes = _usage(tm, tn, tk)
    vmem_limit = int(min(cap, max(vmem_bytes + (16 << 20), 32 << 20)))

    cost = pl.CostEstimate(
        flops=2 * M_pad * N_pad * K_pad,
        transcendentals=0,
        bytes_accessed=int(
            M_pad * K_pad * x_isz * grid_n          # x re-read once per j
            + K_pad * N_pad * w_isz * grid_m        # W re-read once per i
            + y2.size * y_isz
            + (N_pad * b_isz * grid_m if has_bias else 0)
            + M_pad * N_pad * o_isz
        ),
    )

    kernel = functools.partial(
        _linear_mul_kernel,
        has_bias=has_bias,
        use_scratch_acc=use_scratch_acc,
        mxu_dtype=mxu_dtype,
    )

    out2 = pl.pallas_call(
        kernel,
        out_shape=jax.ShapeDtypeStruct((M_pad, N_pad), out_dtype),
        grid_spec=pltpu.PrefetchScalarGridSpec(
            num_scalar_prefetch=0,
            grid=grid,
            in_specs=in_specs,
            out_specs=pl.BlockSpec((tm, tn), lambda i, j, k: (i, j)),
            scratch_shapes=scratch_shapes,
        ),
        compiler_params=pltpu.CompilerParams(
            dimension_semantics=("parallel", "parallel", "arbitrary"),
            vmem_limit_bytes=vmem_limit,
        ),
        cost_estimate=cost,
    )(*inputs)

    return out2[:M, :N].reshape(out_shape_full)


if __name__ == "__main__":
    # Small shapes consistent with the module's forward:
    #   x: [batch, seq, in_features], y broadcastable vs [batch, seq, out_features]
    batch, seq, in_features, out_features = 2, 8, 32, 64

    key = jax.random.PRNGKey(0)
    kx, ky, kw, kb = jax.random.split(key, 4)

    x = jax.random.normal(kx, (batch, seq, in_features), dtype=jnp.float32)
    y = jax.random.normal(ky, (batch, seq, out_features), dtype=jnp.float32)
    weight = jax.random.normal(kw, (out_features, in_features), dtype=jnp.float32) * 0.05
    bias = jax.random.normal(kb, (out_features,), dtype=jnp.float32) * 0.1

    ref = (jnp.einsum("bsk,nk->bsn", x, weight) + bias) * y

    # Case 1: full-shaped y (the usual linear(x) * y).
    out = jax.block_until_ready(linear_mul(x, y, weight, bias))
    assert out.shape == ref.shape
    assert jnp.allclose(out, ref, atol=1e-4, rtol=1e-4), "mismatch (full y)"

    # Case 2: y broadcast over leading dims (per-feature row).
    y_row = jax.random.normal(ky, (out_features,), dtype=jnp.float32)
    out_row = jax.block_until_ready(linear_mul(x, y_row, weight, bias))
    ref_row = (jnp.einsum("bsk,nk->bsn", x, weight) + bias) * y_row
    assert jnp.allclose(out_row, ref_row, atol=1e-4, rtol=1e-4), "mismatch (row y)"

    # Case 3: y broadcast over the feature dim (per-token scalar column).
    y_col = jax.random.normal(ky, (batch, seq, 1), dtype=jnp.float32)
    out_col = jax.block_until_ready(linear_mul(x, y_col, weight, bias))
    ref_col = (jnp.einsum("bsk,nk->bsn", x, weight) + bias) * y_col
    assert jnp.allclose(out_col, ref_col, atol=1e-4, rtol=1e-4), "mismatch (col y)"

    # Case 4: no bias.
    out_nb = jax.block_until_ready(linear_mul(x, y, weight, None))
    ref_nb = jnp.einsum("bsk,nk->bsn", x, weight) * y
    assert jnp.allclose(out_nb, ref_nb, atol=1e-4, rtol=1e-4), "mismatch (no bias)"

    # Case 5: bf16 MXU operands (f32 accumulation) — recommended fast mode.
    out_bf = jax.block_until_ready(
        linear_mul(x, y, weight, bias, mxu_dtype=jnp.bfloat16))
    assert jnp.allclose(out_bf, ref, atol=5e-2, rtol=5e-2), "mismatch (bf16 MXU)"

    print("KERNEL_OK")
</pallas_src>

<mosaic_0001>
module attributes {stable_mosaic.version = 11 : i64} {
  func.func @_linear_mul_kernel(%arg0: i32, %arg1: i32, %arg2: i32, %arg3: memref<8x128xf32, #tpu.memory_space<vmem>>, %arg4: memref<128x128xf32, #tpu.memory_space<vmem>>, %arg5: memref<1x128xf32, #tpu.memory_space<vmem>>, %arg6: memref<8x128xf32, #tpu.memory_space<vmem>>, %arg7: memref<8x128xf32, #tpu.memory_space<vmem>>) attributes {dimension_semantics = [#tpu.dimension_semantics<parallel>, #tpu.dimension_semantics<parallel>, #tpu.dimension_semantics<arbitrary>], iteration_bounds = array<i64: 2, 1, 1>, scalar_prefetch = 0 : i64, scratch_operands = 0 : i64, tpu.core_type = #tpu.core_type<tc>, window_params = [{transform_indices = @transform_0, window_bounds = array<i64: 8, 128>}, {transform_indices = @transform_1, window_bounds = array<i64: 128, 128>}, {transform_indices = @transform_2, window_bounds = array<i64: 1, 128>}, {transform_indices = @transform_3, window_bounds = array<i64: 8, 128>}, {transform_indices = @transform_4, window_bounds = array<i64: 8, 128>}]} {
    %c0_i32 = arith.constant 0 : i32
    %0 = arith.cmpi eq, %arg2, %c0_i32 : i32
    %1 = arith.extui %0 : i1 to i32
    %c0_i32_0 = arith.constant 0 : i32
    %2 = arith.cmpi ne, %1, %c0_i32_0 : i32
    scf.if %2 {
      %c0_10 = arith.constant 0 : index
      %c0_11 = arith.constant 0 : index
      %12 = vector.load %arg5[%c0_10, %c0_11] : memref<1x128xf32, #tpu.memory_space<vmem>>, vector<1x128xf32>
      %13 = vector.shape_cast %12 : vector<1x128xf32> to vector<1x128xf32>
      %14 = vector.broadcast %13 : vector<1x128xf32> to vector<8x128xf32>
      %c0_12 = arith.constant 0 : index
      %c0_13 = arith.constant 0 : index
      %15 = vector.load %arg7[%c0_12, %c0_13] : memref<8x128xf32, #tpu.memory_space<vmem>>, vector<8x128xf32>
      tpu.vector_store %arg7[%c0_12, %c0_13], %14 {strides = array<i32>} : memref<8x128xf32, #tpu.memory_space<vmem>>, vector<8x128xf32>,
    } else {
    }
    %c0 = arith.constant 0 : index
    %c0_1 = arith.constant 0 : index
    %3 = vector.load %arg3[%c0, %c0_1] : memref<8x128xf32, #tpu.memory_space<vmem>>, vector<8x128xf32>
    %c0_2 = arith.constant 0 : index
    %c0_3 = arith.constant 0 : index
    %4 = vector.load %arg4[%c0_2, %c0_3] : memref<128x128xf32, #tpu.memory_space<vmem>>, vector<128x128xf32>
    %c0_4 = arith.constant 0 : index
    %c0_5 = arith.constant 0 : index
    %5 = vector.load %arg7[%c0_4, %c0_5] : memref<8x128xf32, #tpu.memory_space<vmem>>, vector<8x128xf32>
    %cst = arith.constant dense<0.000000e+00> : vector<8x128xf32>
    %6 = tpu.matmul %3, %4, %cst {dimension_numbers = #tpu.dot_dimension_numbers<[1], [0], [0], [1], [0, 0, 1, 1], [], []>} : vector<8x128xf32>, vector<128x128xf32>, vector<8x128xf32> -> vector<8x128xf32>
    %7 = arith.addf %5, %6 : vector<8x128xf32>
    %c0_6 = arith.constant 0 : index
    %c0_7 = arith.constant 0 : index
    %8 = vector.load %arg7[%c0_6, %c0_7] : memref<8x128xf32, #tpu.memory_space<vmem>>, vector<8x128xf32>
    tpu.vector_store %arg7[%c0_6, %c0_7], %7 {strides = array<i32>} : memref<8x128xf32, #tpu.memory_space<vmem>>, vector<8x128xf32>,
    %c0_i32_8 = arith.constant 0 : i32
    %9 = arith.cmpi eq, %arg2, %c0_i32_8 : i32
    %10 = arith.extui %9 : i1 to i32
    %c0_i32_9 = arith.constant 0 : i32
    %11 = arith.cmpi ne, %10, %c0_i32_9 : i32
    scf.if %11 {
      %c0_10 = arith.constant 0 : index
      %c0_11 = arith.constant 0 : index
      %12 = vector.load %arg7[%c0_10, %c0_11] : memref<8x128xf32, #tpu.memory_space<vmem>>, vector<8x128xf32>
      %c0_12 = arith.constant 0 : index
      %c0_13 = arith.constant 0 : index
      %13 = vector.load %arg6[%c0_12, %c0_13] : memref<8x128xf32, #tpu.memory_space<vmem>>, vector<8x128xf32>
      %14 = arith.mulf %12, %13 : vector<8x128xf32>
      %c0_14 = arith.constant 0 : index
      %c0_15 = arith.constant 0 : index
      %15 = vector.load %arg7[%c0_14, %c0_15] : memref<8x128xf32, #tpu.memory_space<vmem>>, vector<8x128xf32>
      tpu.vector_store %arg7[%c0_14, %c0_15], %14 {strides = array<i32>} : memref<8x128xf32, #tpu.memory_space<vmem>>, vector<8x128xf32>,
    } else {
    }
    return
  }
  func.func @transform_0(%arg0: i32, %arg1: i32, %arg2: i32) -> (i32, i32) {
    %c0_i32 = arith.constant 0 : i32
    return %arg0, %arg2 : i32, i32
  }
  func.func @transform_1(%arg0: i32, %arg1: i32, %arg2: i32) -> (i32, i32) {
    %c0_i32 = arith.constant 0 : i32
    return %arg2, %arg1 : i32, i32
  }
  func.func @transform_2(%arg0: i32, %arg1: i32, %arg2: i32) -> (i32, i32) {
    %c0_i32 = arith.constant 0 : i32
    %c0_i32_0 = arith.constant 0 : i32
    return %c0_i32, %arg1 : i32, i32
  }
  func.func @transform_3(%arg0: i32, %arg1: i32, %arg2: i32) -> (i32, i32) {
    %c0_i32 = arith.constant 0 : i32
    return %arg0, %arg1 : i32, i32
  }
  func.func @transform_4(%arg0: i32, %arg1: i32, %arg2: i32) -> (i32, i32) {
    %c0_i32 = arith.constant 0 : i32
    return %arg0, %arg1 : i32, i32
  }
}

</mosaic_0001>

<bundles_post_ra>
// kernel: linear_mul.1
= control target key start
LH: loop header
LB: loop body
LE: loop exit
PB: predicated region body
PF: predicated region fallthrough
CT: control target
= control target key end

     0   :  { %s680_s15 = smov 0   ;;  %s682_s16 = smov 0   ;;  %s771_s0 = inlined_call_operand.vmem [shape: f32[16,128], index: 0, kind: input, shape index: {}]   ;;  %s772_s1 = inlined_call_operand.vmem [shape: f32[128,128], index: 1, kind: input, shape index: {}]   ;;  %s773_s2 = inlined_call_operand.vmem [shape: f32[1,128], index: 2, kind: input, shape index: {}]   ;;  %s774_s3 = inlined_call_operand.vmem [shape: f32[16,128], index: 3, kind: input, shape index: {}]   ;;  %s775_s4 = inlined_call_operand.vmem [shape: f32[16,128], index: 4, kind: output, shape index: {}]  }
   0x1   :  { %s684_s17 = smov 0  }
   0x2 LB: > { %s33_s18 = sadd.s32 1, %s647_s16  ;;  %p544_p0 = scmp.ge.s32.totalorder %s651_s17, 1  ;;  %s651_s17 = sphi %s684_s17, %s14_s17   ;;  %s647_s16 = sphi %s682_s16, %s777_s16   ;;  %s643_s15 = sphi %s680_s15, %s776_s15  }
   0x3   : > { %p35_p1 = scmp.ge.s32.totalorder %s33_s18, 2  ;;  %p225_p2 = scmp.lt.s32.totalorder %s651_s17, 3 }
   0x5   : > { %s779_s18 = smov (%p35_p1, %s33_s18), 0  ;;  %p226_p3 = pnand %p544_p0, %p225_p2 }
   0x6   : > { %p273_p4 = scmp.lt.s32.totalorder (!%p226_p3), %s643_s15, 1 }
   0x7   : > { %229 = sbr.rel (%p226_p3) target bundleno = 243 (0xf3), region = 36 }
   0xc   : > { %v334_v0 = vld [vmem:[%s772_s1 + $0x78] sm:$0xff]  ;;  %v653_v1 = vmov 0.0   ;;  %v333_v2 = vld [vmem:[%s772_s1 + $0x70] sm:$0xff]  ;;  %vm654_vm0 = vmmov 0   ;;  %v332_v3 = vld [vmem:[%s772_s1 + $0x68] sm:$0xff]  ;;  %s781_s15 = smov (!%p273_p4, %s643_s15), 1 }
   0xd   : > { %568 = vmatprep.subr.mxu0 %v653_v1  ;;  %600 = vmatprep.mubr.msk.f32.mxu0 %vm654_vm0, %v653_v1  ;;  %v331_v4 = vld [vmem:[%s772_s1 + $0x60] sm:$0xff]  ;;  %v330_v5 = vld [vmem:[%s772_s1 + $0x58] sm:$0xff]  ;;  %v329_v6 = vld [vmem:[%s772_s1 + $0x50] sm:$0xff]  ;;  %s545_s23 = sshll.u32 %s781_s15, 3 }
   0xe   : > { %569 = vmatpush3.msra.mxu0 %v334_v0  ;;  %v328_v7 = vld [vmem:[%s772_s1 + $0x48] sm:$0xff]  ;;  %v327_v8 = vld [vmem:[%s772_s1 + $0x40] sm:$0xff]  ;;  %v326_v9 = vld [vmem:[%s772_s1 + $0x38] sm:$0xff]  ;;  %s279_s30 = scalar_lea.vmem %s771_s0, %s545_s23  ;;  %s298_s8 = scalar_lea.vmem %s774_s3, %s545_s23 }
   0xf   : > { %570 = vmatprep.subr.mxu0 %v653_v1  ;;  %v325_v10 = vld [vmem:[%s772_s1 + $0x30] sm:$0xff]  ;;  %v324_v11 = vld [vmem:[%s772_s1 + $0x28] sm:$0xff]  ;;  %v323_v12 = vld [vmem:[%s772_s1 + $0x20] sm:$0xff]  ;;  %s305_s13 = scalar_lea.vmem %s775_s4, %s545_s23 }
  0x10   : > { %571 = vmatpush3.msra.mxu0 %v333_v2  ;;  %v322_v13 = vld [vmem:[%s772_s1 + $0x18] sm:$0xff]  ;;  %v321_v14 = vld [vmem:[%s772_s1 + $0x10] sm:$0xff]  ;;  %v320_v15 = vld [vmem:[%s772_s1 + $0x8] sm:$0xff] }
  0x11   : > { %572 = vmatprep.subr.mxu0 %v653_v1  ;;  %v319_v16 = vld [vmem:[%s772_s1] sm:$0xff] }
  0x12   : > { %573 = vmatpush3.msra.mxu0 %v332_v3  ;;  %v318_v17 = vld [vmem:[%s279_s30] sm:$0xff] }
  0x13   : > { %574 = vmatprep.subr.mxu0 %v653_v1  ;;  %v548_v18 = vld [vmem:[%s773_s2] ss:$0 sm:$0xff] }
  0x14   : > { %575 = vmatpush3.msra.mxu0 %v331_v4  ;;  %v412_v19 = vld [vmem:[%s298_s8] sm:$0xff] }
  0x15   : > { %576 = vmatprep.subr.mxu0 %v653_v1 }
  0x16   : > { %577 = vmatpush3.msra.mxu0 %v330_v5 }
  0x17   : > { %578 = vmatprep.subr.mxu0 %v653_v1 }
  0x18   : > { %579 = vmatpush3.msra.mxu0 %v329_v6 }
  0x19   : > { %580 = vmatprep.subr.mxu0 %v653_v1 }
  0x1a   : > { %581 = vmatpush3.msra.mxu0 %v328_v7 }
  0x1b   : > { %582 = vmatprep.subr.mxu0 %v653_v1 }
  0x1c   : > { %583 = vmatpush3.msra.mxu0 %v327_v8 }
  0x1d   : > { %584 = vmatprep.subr.mxu0 %v653_v1 }
  0x1e   : > { %585 = vmatpush3.msra.mxu0 %v326_v9 }
  0x1f   : > { %586 = vmatprep.subr.mxu0 %v653_v1 }
  0x20   : > { %587 = vmatpush3.msra.mxu0 %v325_v10 }
  0x21   : > { %588 = vmatprep.subr.mxu0 %v653_v1 }
  0x22   : > { %589 = vmatpush3.msra.mxu0 %v324_v11 }
  0x23   : > { %590 = vmatprep.subr.mxu0 %v653_v1 }
  0x24   : > { %591 = vmatpush3.msra.mxu0 %v323_v12 }
  0x25   : > { %592 = vmatprep.subr.mxu0 %v653_v1 }
  0x26   : > { %593 = vmatpush3.msra.mxu0 %v322_v13 }
  0x27   : > { %594 = vmatprep.subr.mxu0 %v653_v1 }
  0x28   : > { %595 = vmatpush3.msra.mxu0 %v321_v14 }
  0x29   : > { %596 = vmatprep.subr.mxu0 %v653_v1 }
  0x2a   : > { %597 = vmatpush3.msra.mxu0 %v320_v15 }
  0x2b   : > { %598 = vmatprep.subr.mxu0 %v653_v1 }
  0x2c   : > { %599 = vmatpush3.msra.mxu0 %v319_v16 }
  0x2d   : > { %601 = vmatmul.mubr.f32.vlgmr.msra.gmra.mxu0 %v318_v17 }
  0xed   : > { %v402_v20 = vpop.f32.mrf.mxu0 }
  0xee   : > { %v406_v21 = vadd.f32 %v548_v18, %v402_v20 }
  0xef   : > { %v602_v22 = vpop.f32.mrf.mxu0 }
  0xf0   : > { %v413_v23 = vmul.f32 %v412_v19, %v406_v21 }
  0xf2   : > { %414 = vst [vmem:[%s305_s13] sm:$0xff] %v413_v23 }
  0xf3 PF: > { %s14_s17 = sadd.s32 1, %s651_s17   ;;  %s776_s15 = smov %s647_s16 }
  0xf4   : > { %p11_p5 = scmp.ge.s32.totalorder %s14_s17, 4   ;;  %s777_s16 = smov %s779_s18 }
  0xf6   :  { %13 = sbr.rel (!%p11_p5) target bundleno = 2 (0x2), region = 83 }

</bundles_post_ra>
